<compile_context>
chip_gen: v7x
topology: tpu7x:2x2x1
jax: 0.10.0
libtpu: 0.0.40
codegen_flags: <defaults>
</compile_context>

<pallas_src>
import jax
import jax.numpy as jnp
from jax.experimental import pallas as pl
from jax.experimental.pallas import tpu as pltpu


def mlp_proj_kernel(x_ref, w_ref, b_ref, o_ref, acc_ref):
    # x_ref:   (1, tk, tm)  tile of x viewed as (N, C, H*W)  (C-major; no transpose)
    # w_ref:   (tk, tn)     tile of W^T, i.e. (input_dim, embed_dim)
    # b_ref:   (1, tn)      bias tile
    # o_ref:   (1, tm, tn)  tile of output (N, H*W, embed_dim); tn % 128 == 0 -> lane-dense
    # acc_ref: (tm, tn)     f32 accumulator, resident across the K grid axis
    k = pl.program_id(3)

    @pl.when(k == 0)
    def _():
        # Fold the bias into the accumulator init; finalize is then a pure cast.
        acc_ref[...] = jnp.broadcast_to(
            b_ref[...].astype(jnp.float32), acc_ref.shape)

    # out[m, n] += sum_c x[c, m] * w[c, n]
    # The flatten/transpose of the PyTorch forward is absorbed into the
    # transposed-LHS contraction, which the MXU handles natively.
    acc_ref[...] += jax.lax.dot_general(
        x_ref[0], w_ref[...],
        dimension_numbers=(((0,), (0,)), ((), ())),
        preferred_element_type=jnp.float32)

    @pl.when(k == pl.num_programs(3) - 1)
    def _():
        o_ref[0] = acc_ref[...].astype(o_ref.dtype)


def _pick_tile(extent, target, multiple):
    """Largest divisor of `extent` that is <= target and a multiple of
    `multiple`; falls back to the full extent (always a legal single block)."""
    if extent <= target:
        return extent
    t = (target // multiple) * multiple
    while t >= multiple:
        if extent % t == 0:
            return t
        t -= multiple
    return extent


def mlp_forward(x_nchw, weight, bias, *, tm=256, tn=512, tk=512):
    """PyTorch MLP.forward: x.flatten(2).transpose(1, 2) @ weight.T + bias.

    x_nchw: (N, C, H, W); weight: (embed_dim, input_dim); bias: (embed_dim,)
    returns (N, H*W, embed_dim) — same as the PyTorch module.
    """
    N, C, H, W = x_nchw.shape
    E, Cin = weight.shape
    assert Cin == C
    HW = H * W

    # (N, C, H, W) -> (N, C, H*W): merges trailing dims, no data movement.
    x = x_nchw.reshape(N, C, HW)
    # One-time, weight-only transpose so the MXU RHS sits in its natural (K, N)
    # layout (negligible vs. activation traffic; a deployment would simply
    # store the weight pre-transposed).
    w_t = jnp.transpose(weight, (1, 0))          # (C, E)
    b2 = bias.reshape(1, E)

    # Tile sizes: tm/tn land in the lane axis (x lanes / output lanes) -> keep
    # them multiples of 128; tk is a sublane dim -> multiple of 8.
    tm = _pick_tile(HW, tm, 128)
    tn = _pick_tile(E, tn, 128)
    tk = _pick_tile(C, tk, 8)
    # TODO(synk): pad truly non-divisible HW/E/C instead of single-block fallback.

    grid = (N, HW // tm, E // tn, C // tk)

    return pl.pallas_call(
        mlp_proj_kernel,
        out_shape=jax.ShapeDtypeStruct((N, HW, E), x_nchw.dtype),
        grid_spec=pltpu.PrefetchScalarGridSpec(
            num_scalar_prefetch=0,
            grid=grid,
            in_specs=[
                pl.BlockSpec((1, tk, tm), lambda b, m, n, k: (b, k, m)),
                pl.BlockSpec((tk, tn),    lambda b, m, n, k: (k, n)),
                pl.BlockSpec((1, tn),     lambda b, m, n, k: (0, n)),
            ],
            out_specs=pl.BlockSpec((1, tm, tn), lambda b, m, n, k: (b, m, n)),
            scratch_shapes=[pltpu.VMEM((tm, tn), jnp.float32)],
        ),
        compiler_params=pltpu.CompilerParams(
            dimension_semantics=("parallel", "parallel", "parallel", "arbitrary"),
        ),
    )(x, w_t, b2)


def _reference(x_nchw, weight, bias):
    """Pure-JAX reference of the PyTorch forward."""
    N, C, H, W = x_nchw.shape
    xt = jnp.transpose(x_nchw.reshape(N, C, H * W), (0, 2, 1))   # (N, HW, C)
    return xt.astype(jnp.float32) @ weight.T.astype(jnp.float32) + bias


if __name__ == "__main__":
    # MLP(input_dim=256, embed_dim=256) at small, MXU/lane-friendly shapes.
    N, C, H, W = 2, 256, 16, 16
    E = 256

    key = jax.random.PRNGKey(0)
    kx, kw, kb = jax.random.split(key, 3)
    x = jax.random.normal(kx, (N, C, H, W), dtype=jnp.float32)
    weight = jax.random.normal(kw, (E, C), dtype=jnp.float32) * (1.0 / C ** 0.5)
    bias = 0.1 * jax.random.normal(kb, (E,), dtype=jnp.float32)

    # Use 128-tiles here so the demo actually exercises a (2, 2, 2, 2) grid
    # (pipelined HBM->VMEM streaming + resident accumulator across K).
    out = mlp_forward(x, weight, bias, tm=128, tn=128, tk=128)
    out = jax.block_until_ready(out)

    ref = _reference(x, weight, bias)
    assert out.shape == (N, H * W, E), out.shape
    err = float(jnp.max(jnp.abs(out - ref)))
    assert jnp.allclose(out, ref, rtol=1e-4, atol=1e-4), err

    print("KERNEL_OK")
</pallas_src>

<mosaic_0001>
module attributes {stable_mosaic.version = 11 : i64} {
  func.func @mlp_proj_kernel(%arg0: i32, %arg1: i32, %arg2: i32, %arg3: i32, %arg4: memref<1x128x128xf32, #tpu.memory_space<vmem>>, %arg5: memref<128x128xf32, #tpu.memory_space<vmem>>, %arg6: memref<1x128xf32, #tpu.memory_space<vmem>>, %arg7: memref<1x128x128xf32, #tpu.memory_space<vmem>>, %arg8: memref<128x128xf32, #tpu.memory_space<vmem>>) attributes {dimension_semantics = [#tpu.dimension_semantics<parallel>, #tpu.dimension_semantics<parallel>, #tpu.dimension_semantics<parallel>, #tpu.dimension_semantics<arbitrary>], iteration_bounds = array<i64: 2, 2, 2, 2>, scalar_prefetch = 0 : i64, scratch_operands = 1 : i64, tpu.core_type = #tpu.core_type<tc>, window_params = [{transform_indices = @transform_0, window_bounds = array<i64: 1, 128, 128>}, {transform_indices = @transform_1, window_bounds = array<i64: 128, 128>}, {transform_indices = @transform_2, window_bounds = array<i64: 1, 128>}, {transform_indices = @transform_3, window_bounds = array<i64: 1, 128, 128>}]} {
    %c0_i32 = arith.constant 0 : i32
    %0 = arith.cmpi eq, %arg3, %c0_i32 : i32
    %1 = arith.extui %0 : i1 to i32
    %c0_i32_0 = arith.constant 0 : i32
    %2 = arith.cmpi ne, %1, %c0_i32_0 : i32
    scf.if %2 {
      %c0_10 = arith.constant 0 : index
      %c0_11 = arith.constant 0 : index
      %13 = vector.load %arg6[%c0_10, %c0_11] : memref<1x128xf32, #tpu.memory_space<vmem>>, vector<1x128xf32>
      %14 = vector.shape_cast %13 : vector<1x128xf32> to vector<1x128xf32>
      %15 = vector.broadcast %14 : vector<1x128xf32> to vector<128x128xf32>
      %c0_12 = arith.constant 0 : index
      %c0_13 = arith.constant 0 : index
      %16 = vector.load %arg8[%c0_12, %c0_13] : memref<128x128xf32, #tpu.memory_space<vmem>>, vector<128x128xf32>
      tpu.vector_store %arg8[%c0_12, %c0_13], %15 {strides = array<i32>} : memref<128x128xf32, #tpu.memory_space<vmem>>, vector<128x128xf32>,
    } else {
    }
    %c0 = arith.constant 0 : index
    %c0_1 = arith.constant 0 : index
    %3 = vector.load %arg8[%c0, %c0_1] : memref<128x128xf32, #tpu.memory_space<vmem>>, vector<128x128xf32>
    %c0_2 = arith.constant 0 : index
    %c0_3 = arith.constant 0 : index
    %c0_4 = arith.constant 0 : index
    %4 = vector.load %arg4[%c0_2, %c0_3, %c0_4] : memref<1x128x128xf32, #tpu.memory_space<vmem>>, vector<1x128x128xf32>
    %5 = vector.shape_cast %4 : vector<1x128x128xf32> to vector<128x128xf32>
    %c0_5 = arith.constant 0 : index
    %c0_6 = arith.constant 0 : index
    %6 = vector.load %arg5[%c0_5, %c0_6] : memref<128x128xf32, #tpu.memory_space<vmem>>, vector<128x128xf32>
    %cst = arith.constant dense<0.000000e+00> : vector<128x128xf32>
    %7 = tpu.matmul %5, %6, %cst {dimension_numbers = #tpu.dot_dimension_numbers<[0], [0], [1], [1], [0, 1, 1, 1], [], []>} : vector<128x128xf32>, vector<128x128xf32>, vector<128x128xf32> -> vector<128x128xf32>
    %8 = arith.addf %3, %7 : vector<128x128xf32>
    %c0_7 = arith.constant 0 : index
    %c0_8 = arith.constant 0 : index
    %9 = vector.load %arg8[%c0_7, %c0_8] : memref<128x128xf32, #tpu.memory_space<vmem>>, vector<128x128xf32>
    tpu.vector_store %arg8[%c0_7, %c0_8], %8 {strides = array<i32>} : memref<128x128xf32, #tpu.memory_space<vmem>>, vector<128x128xf32>,
    %c1_i32 = arith.constant 1 : i32
    %10 = arith.cmpi eq, %arg3, %c1_i32 : i32
    %11 = arith.extui %10 : i1 to i32
    %c0_i32_9 = arith.constant 0 : i32
    %12 = arith.cmpi ne, %11, %c0_i32_9 : i32
    scf.if %12 {
      %c0_10 = arith.constant 0 : index
      %c0_11 = arith.constant 0 : index
      %13 = vector.load %arg8[%c0_10, %c0_11] : memref<128x128xf32, #tpu.memory_space<vmem>>, vector<128x128xf32>
      %c0_12 = arith.constant 0 : index
      %c0_13 = arith.constant 0 : index
      %c0_14 = arith.constant 0 : index
      %14 = vector.load %arg7[%c0_12, %c0_13, %c0_14] : memref<1x128x128xf32, #tpu.memory_space<vmem>>, vector<1x128x128xf32>
      %15 = vector.shape_cast %14 : vector<1x128x128xf32> to vector<128x128xf32>
      %16 = vector.shape_cast %13 : vector<128x128xf32> to vector<1x128x128xf32>
      tpu.vector_store %arg7[%c0_12, %c0_13, %c0_14], %16 {strides = array<i32>} : memref<1x128x128xf32, #tpu.memory_space<vmem>>, vector<1x128x128xf32>,
    } else {
    }
    return
  }
  func.func @transform_0(%arg0: i32, %arg1: i32, %arg2: i32, %arg3: i32) -> (i32, i32, i32) {
    %c0_i32 = arith.constant 0 : i32
    return %arg0, %arg3, %arg1 : i32, i32, i32
  }
  func.func @transform_1(%arg0: i32, %arg1: i32, %arg2: i32, %arg3: i32) -> (i32, i32) {
    %c0_i32 = arith.constant 0 : i32
    return %arg3, %arg2 : i32, i32
  }
  func.func @transform_2(%arg0: i32, %arg1: i32, %arg2: i32, %arg3: i32) -> (i32, i32) {
    %c0_i32 = arith.constant 0 : i32
    %c0_i32_0 = arith.constant 0 : i32
    return %c0_i32, %arg2 : i32, i32
  }
  func.func @transform_3(%arg0: i32, %arg1: i32, %arg2: i32, %arg3: i32) -> (i32, i32, i32) {
    %c0_i32 = arith.constant 0 : i32
    return %arg0, %arg1, %arg2 : i32, i32, i32
  }
}

</mosaic_0001>

<bundles_post_ra>
// kernel: tpu_custom_call.1
= control target key start
LH: loop header
LB: loop body
LE: loop exit
PB: predicated region body
PF: predicated region fallthrough
CT: control target
= control target key end

     0   :  { %s1861_s0 = inlined_call_operand.hbm [shape: f32[2,256,256], index: 0, kind: input, shape index: {}]   ;;  %s1862_s1 = inlined_call_operand.hbm [shape: f32[256,256], index: 1, kind: input, shape index: {}]   ;;  %s1863_s2 = inlined_call_operand.vmem [shape: f32[1,256], index: 2, kind: input, shape index: {}]   ;;  %s1864_s3 = inlined_call_operand.hbm [shape: f32[2,256,256], index: 3, kind: output, shape index: {}]  }
   0x1   :  { %1889 = sst [smem:[#allocation27_spill]] %s1861_s0 }
   0x2   :  { %1890 = sst [smem:[#allocation28_spill]] %s1863_s2 }
   0x3   :  { %1891 = sst [smem:[#allocation29_spill]] %s1864_s3 }
   0x4   :  { %8 = vsyncpa [#allocation4], 0 }
   0x5   :  { %10 = vsyncpa [#allocation4 + $0x1], 0 }
   0x6   :  { %11 = vsyncpa [#allocation7], 0 }
   0x7   :  { %13 = vsyncpa [#allocation7 + $0x1], 0 }
   0x8   :  { %14 = vsyncpa [#allocation5], 0 }
   0x9   :  { %16 = vsyncpa [#allocation5 + $0x1], 0  ;;  %s1372_s12 = smov 0   ;;  %s1374_s13 = smov 0  }
   0xa   :  { %s1376_s14 = smov 0   ;;  %s1378_s15 = smov 0  }
   0xb   :  { %s1380_s16 = smov 0   ;;  %s1382_s17 = smov 0  }
   0xc   :  { %s1384_s18 = smov 0   ;;  %s1386_s19 = smov 0  }
   0xd   :  { %s1388_s20 = smov 0   ;;  %s1390_s21 = smov 0  }
   0xe   :  { %s1392_s22 = smov 0   ;;  %s1394_s23 = smov 0  }
   0xf   :  { %s1396_s24 = smov 0   ;;  %s1398_s25 = smov 0  }
  0x10   :  { %s1400_s26 = smov 0   ;;  %s1402_s27 = smov 0  }
  0x11   :  { %s1404_s28 = smov 0   ;;  %s1406_s29 = smov 0  }
  0x12 LB: > { %1892 = sst [smem:[#allocation12_spill]] %s1273_s12  ;;  %s37_s30 = sadd.s32 1, %s1325_s25  ;;  %s1341_s29 = sphi %s1406_s29, %s22_s29   ;;  %s1337_s28 = sphi %s1404_s28, %s1973_s28   ;;  %s1333_s27 = sphi %s1402_s27, %s1956_s27   ;;  %s1329_s26 = sphi %s1400_s26, %s1972_s26   ;;  %s1325_s25 = sphi %s1398_s25, %s1971_s25   ;;  %s1321_s24 = sphi %s1396_s24, %s1970_s24   ;;  %s1317_s23 = sphi %s1394_s23, %s1969_s23   ;;  %s1313_s22 = sphi %s1392_s22, %s1968_s22   ;;  %s1309_s21 = sphi %s1390_s21, %s1967_s21   ;;  %s1305_s20 = sphi %s1388_s20, %s1966_s20   ;;  %s1301_s19 = sphi %s1386_s19, %s1965_s19   ;;  %s1297_s18 = sphi %s1384_s18, %s1951_s18   ;;  %s1293_s17 = sphi %s1382_s17, %s1964_s17   ;;  %s1289_s16 = sphi %s1380_s16, %s1963_s16   ;;  %s1285_s15 = sphi %s1378_s15, %s1962_s15   ;;  %s1281_s14 = sphi %s1376_s14, %s1960_s14   ;;  %s1277_s13 = sphi %s1374_s13, %s1959_s13   ;;  %s1273_s12 = sphi %s1372_s12, %s1957_s12  }
  0x13   : > { %1893 = sst [smem:[#allocation13_spill]] %s1293_s17  ;;  %s1865_s4 = sadd.s32 4294967295, %s1341_s29  }
  0x14   : > { %1894 = sst [smem:[#allocation14_spill]] %s1301_s19  ;;  %p1462_p0 = scmp.ge.s32.totalorder %s37_s30, 2 }
  0x15   : > { %1895 = sst [smem:[#allocation15_spill]] %s1309_s21  ;;  %p66_p1 = scmp.ne.s32.totalorder %s1305_s20, %s1301_s19 }
  0x16   : > { %1896 = sst [smem:[#allocation16_spill]] %s1313_s22  ;;  %s1975_s30 = smov (%p1462_p0, %s37_s30), 0 }
  0x17   : > { %1897 = sst [smem:[#allocation17_spill]] %s1317_s23  ;;  %p1873_p2 = scmp.eq.s32.totalorder %s1341_s29, 0 }
  0x18   : > { %1898 = sst [smem:[#allocation18_spill]] %s1321_s24  ;;  %p72_p3 = scmp.ne.s32.totalorder %s1301_s19, %s1297_s18 }
  0x19   : > { %1899 = sst [smem:[#allocation19_spill]] %s1333_s27  ;;  %s1479_s9 = ssub.s32 %s1325_s25, %s1975_s30 }
  0x1a   : > { %1900 = sst [smem:[#allocation20_spill]] %s1337_s28  ;;  %p1483_p4 = scmp.eq.s32.totalorder %s1865_s4, 0 }
  0x1b   : > { %1902 = sst [smem:[#allocation21_spill]] %s1975_s30  ;;  %p1489_p5 = por %p1873_p2, %p66_p1 }
  0x1c   : > { %s1903_s10 = scalar_select %p1483_p4, 1, 0 }
  0x1d   : > { %p1495_p6 = por %p1483_p4, %p72_p3  ;;  %p1872_p7 = scmp.lt.s32.totalorder %s1341_s29, 16 }
  0x1e   : > { %s180_s18 = sand.u32 1, %s1305_s20   ;;  %s1879_s7 = sshll.u32 %s1325_s25, 5 }
  0x1f   : > { %s1905_s8 = scalar_select %p1495_p6, 1, 0 }
  0x20   : > { %s768_s6 = sshll.u32 %s180_s18, 7  ;;  %s190_s4 = sadd.s32 %s1333_s27, %s1879_s7 }
  0x21   : > { %1906 = sst [smem:[#allocation22_spill]] %s1905_s8  ;;  %s771_s30 = sshll.u32 %s1337_s28, 6 }
  0x22   : > { %s184_s3 = scalar_lea.vmem [#allocation3], %s768_s6  ;;  %s192_s23 = sadd.s32 %s771_s30, %s190_s4 }
  0x23   : > { %s195_s24 = sshll.u32 %s184_s3, 4  ;;  %s772_s21 = sshll.u32 %s192_s23, 7  ;;  %s1506_s24 = int_to_ptr.vmem [resolvable:$true] %s195_s24 }
  0x24   : > { %p1512_p8 = pnand %p1872_p7, %p1489_p5  ;;  %s1908_s0 = sld [smem:[#allocation27_spill]] }
  0x25   : > { %s1522_s3 = scalar_lea.sflag [#allocation4], %s180_s18 }
  0x26   : > { %p1101_p11 = pneg %p1512_p8 }
  0x2a   : > { %s1519_s19 = scalar_lea.hbm %s1908_s0, %s772_s21  ;;  %s1104_s21 = scalar_lea.hbm %s1908_s0, 16384 }
  0x2b   : > { %s1099_s23 = scalar_lea.hbm %s1519_s19, 2048  ;;  %p1105_p1 = scmp.lt.u32.totalorder %s1519_s19, %s1908_s0 }
  0x2c   : > { %p1100_p10 = scmp.ne.s32.totalorder %s1519_s19, %s1099_s23  ;;  %p1106_p3 = scmp.lt.u32.totalorder %s1104_s21, %s1099_s23 }
  0x2d   : > { %p1108_p7 = scmp.lt.u32.totalorder %s1099_s23, %s1519_s19 }
  0x2e   : > { %p1102_p12 = pnand %p1101_p11, %p1100_p10  ;;  %p1107_p5 = por %p1106_p3, %p1105_p1 }
  0x30   : > { %p1103_p13 = pneg %p1102_p12  ;;  %p1109_p2 = por %p1108_p7, %p1107_p5 }
  0x32   : > { %p1110_p9 = pnand %p1109_p2, %p1103_p13 }
  0x34   : > { %1113 = shalt.err (!%p1110_p9)
}
  0x35   : > { %s1114_s8 = scalar_lea.vmem %s1506_s24, 2048  ;;  %s1343_s11 = smov [#allocation3]  }
  0x36   : > { %p1115_p10 = scmp.ne.s32.totalorder %s1506_s24, %s1114_s8  ;;  %s1119_s18 = sshll.u32 %s1343_s11, 4  ;;  %s1120_s18 = int_to_ptr.vmem [resolvable:$false] %s1119_s18 }
  0x37   : > { %s1121_s22 = scalar_lea.vmem %s1120_s18, 4096  ;;  %p1122_p4 = scmp.lt.s32.totalorder %s1506_s24, %s1120_s18 }
  0x38   : > { %p1117_p12 = pnand %p1115_p10, %p1101_p11  ;;  %p1123_p1 = scmp.lt.s32.totalorder %s1121_s22, %s1114_s8 }
  0x3a   : > { %p1118_p6 = pneg %p1117_p12  ;;  %p1124_p3 = por %p1123_p1, %p1122_p4 }
  0x3c   : > { %p1125_p7 = pnand %p1124_p3, %p1118_p6 }
  0x3e   : > { %1128 = shalt.err (!%p1125_p7)
}
  0x3f   : > { %s1876_s23 = smov 256   ;;  %s1877_s30 = smov 128  }
  0x40   : > { %s1878_s21 = smov 8   ;;  %s1909_s4 = sadd.s32 4294967295, %s1341_s29  }
  0x41   : > { %939 = dma.hbm_to_vmem [thread:$0]  (!%p1512_p8), %s1519_s19, 2048, %s1506_s24, %s1522_s3, %s1876_s23, %s1877_s30, %s1878_s21  }
  0x42   : > { %p1555_p2 = scmp.eq.s32.totalorder %s1909_s4, 15  ;;  %p232_p4 = scmp.lt.s32.totalorder %s1341_s29, 17 }
  0x43   : > { %p1911_p6 = scmp.ge.s32.totalorder %s1341_s29, 1  ;;  %s40_s2 = sadd.s32 1, %s1329_s26 }
  0x44   : > { %s1977_s2 = smov (!%p1462_p0, %s40_s2), %s1329_s26  ;;  %s765_s19 = sadd.s32 4294967294, %s1341_s29  }
  0x45   : > { %p1562_p9 = pnand %p1911_p6, %p232_p4  ;;  %p94_p8 = scmp.ne.s32.totalorder %s1293_s17, %s1289_s16 }
  0x46   : > { %p42_p11 = scmp.ge.s32.totalorder %s1977_s2, 2  ;;  %p100_p13 = scmp.ne.s32.totalorder %s1289_s16, %s1285_s15 }
  0x47   : > { %s87_s24 = sadd.s32 1, %s1293_s17  ;;  %p1913_p5 = scmp.eq.s32.totalorder %s1341_s29, 0 }
  0x48   : > { %s1979_s2 = smov (%p42_p11, %s1977_s2), 0  ;;  %s1916_s5 = sadd.s32 1, %s1333_s27 }
  0x49   : > { %p1578_p10 = por %p94_p8, %p1913_p5  ;;  %1915 = sst [smem:[#allocation23_spill]] %s1979_s2 }
  0x4a   : > { %s1981_s5 = smov (!%p42_p11, %s1916_s5), %s1333_s27  ;;  %s83_s11 = ssub.s32 %s1329_s26, %s1979_s2 }
  0x4b   : > { %p1917_p0 = scmp.ne.s32.totalorder %s1903_s10, 0  ;;  %p46_p1 = scmp.ge.s32.totalorder %s1981_s5, 2 }
  0x4c   : > { %s84_s18 = sor.u32 %s83_s11, %s1479_s9  ;;  %p153_p7 = scmp.ne.s32.totalorder %s1281_s14, %s1277_s13 }
  0x4d   : > { %p1591_p12 = por %p100_p13, %p1917_p0  ;;  %p85_p3 = scmp.eq.s32.totalorder %s84_s18, 0 }
  0x4e   : > { %s1983_s5 = smov (%p46_p1, %s1981_s5), 0  ;;  %s1920_s22 = sadd.s32 1, %s1337_s28 }
  0x4f   : > { %s1918_s15 = scalar_select %p1591_p12, 1, 0 }
  0x50   : > { %1919 = sst [smem:[#allocation24_spill]] %s1983_s5  ;;  %s1985_s22 = smov (!%p46_p1, %s1920_s22), %s1337_s28 }
  0x51   : > { %s143_s4 = sadd.s32 1, %s1281_s14  ;;  %p1606_p4 = por %p1555_p2, %p153_p7 }
  0x52   : > { %p50_p6 = scmp.ge.s32.totalorder %s1985_s22, 2  ;;  %s55_s23 = ssub.s32 %s1333_s27, %s1983_s5 }
  0x53   : > { %s1921_s10 = scalar_select %p1606_p4, 1, 0 }
  0x54   : > { %s1613_s30 = scalar_select %p85_p3, %s1293_s17, %s87_s24  }
  0x55   : > { %s1987_s22 = smov (%p50_p6, %s1985_s22), 0  ;;  %p159_p8 = scmp.ne.s32.totalorder %s1277_s13, %s1273_s12 }
  0x56   : > { %1922 = sst [smem:[#allocation25_spill]] %s1613_s30  ;;  %p160_p11 = scmp.eq.s32.totalorder %s765_s19, 15 }
  0x57   : > { %1923 = sst [smem:[#allocation26_spill]] %s1987_s22  ;;  %s52_s18 = ssub.s32 %s1337_s28, %s1987_s22 }
  0x58   : > { %s205_s6 = sand.u32 1, %s1293_s17   ;;  %s54_s21 = sor.u32 %s1479_s9, %s52_s18 }
  0x59   : > { %s138_s7 = sor.u32 %s55_s23, %s52_s18  ;;  %s56_s0 = sor.u32 %s55_s23, %s54_s21 }
  0x5a   : > { %s140_s2 = sor.u32 %s138_s7, %s83_s11  ;;  %p57_p2 = scmp.eq.s32.totalorder %s56_s0, 0 }
  0x5b   : > { %p141_p13 = scmp.eq.s32.totalorder %s140_s2, 0  ;;  %p1623_p5 = por %p160_p11, %p159_p8 }
  0x5c   : > { %s773_s5 = sshll.u32 %s205_s6, 7  ;;  %s1925_s27 = sadd.s32 1, %s1305_s20 }
  0x5d   : > { %s1924_s24 = scalar_select %p1623_p5, 1, 0 }
  0x5e   : > { %s1630_s30 = scalar_select %p57_p2, %s1305_s20, %s1925_s27  }
  0x5f   : > { %s1633_s12 = scalar_select %p141_p13, %s1281_s14, %s143_s4  }
  0x60   : > { %s1926_s19 = sshll.u32 %s1325_s25, 5  ;;  %s209_s28 = scalar_lea.vmem [#allocation6], %s773_s5 }
  0x61   : > { %s215_s22 = sadd.s32 %s1329_s26, %s1926_s19  ;;  %s218_s17 = sshll.u32 %s209_s28, 4  ;;  %s1643_s17 = int_to_ptr.vmem [resolvable:$true] %s218_s17 }
  0x62   : > { %s776_s9 = sshll.u32 %s215_s22, 7  ;;  %p1927_p0 = scmp.lt.s32.totalorder %s1341_s29, 16 }
  0x63   : > { %s1641_s0 = scalar_lea.hbm %s1862_s1, %s776_s9  ;;  %s1653_s28 = scalar_lea.sflag [#allocation7], %s205_s6 }
  0x64   : > { %p1649_p1 = pnand %p1927_p0, %p1578_p10  ;;  %s1129_s7 = scalar_lea.hbm %s1641_s0, 2048 }
  0x65   : > { %p1130_p3 = scmp.ne.s32.totalorder %s1641_s0, %s1129_s7  ;;  %s1134_s3 = scalar_lea.hbm %s1862_s1, 8192 }
  0x66   : > { %p1131_p7 = pneg %p1649_p1  ;;  %p1135_p10 = scmp.lt.u32.totalorder %s1641_s0, %s1862_s1 }
  0x67   : > { %p1136_p11 = scmp.lt.u32.totalorder %s1134_s3, %s1129_s7  ;;  %p1138_p13 = scmp.lt.u32.totalorder %s1129_s7, %s1641_s0 }
  0x68   : > { %p1132_p6 = pnand %p1131_p7, %p1130_p3 }
  0x69   : > { %p1137_p2 = por %p1136_p11, %p1135_p10 }
  0x6a   : > { %p1133_p8 = pneg %p1132_p6 }
  0x6b   : > { %p1139_p0 = por %p1138_p13, %p1137_p2 }
  0x6d   : > { %p1140_p5 = pnand %p1139_p0, %p1133_p8 }
  0x6f   : > { %1143 = shalt.err (!%p1140_p5)
}
  0x70   : > { %s1144_s22 = scalar_lea.vmem %s1643_s17, 2048  ;;  %s1347_s4 = smov [#allocation6]  }
  0x71   : > { %p1145_p3 = scmp.ne.s32.totalorder %s1643_s17, %s1144_s22  ;;  %s1149_s6 = sshll.u32 %s1347_s4, 4  ;;  %s1150_s6 = int_to_ptr.vmem [resolvable:$false] %s1149_s6 }
  0x72   : > { %s1151_s19 = scalar_lea.vmem %s1150_s6, 4096  ;;  %p1152_p12 = scmp.lt.s32.totalorder %s1643_s17, %s1150_s6 }
  0x73   : > { %p1147_p6 = pnand %p1145_p3, %p1131_p7  ;;  %p1153_p10 = scmp.lt.s32.totalorder %s1151_s19, %s1144_s22 }
  0x75   : > { %p1148_p4 = pneg %p1147_p6  ;;  %p1154_p11 = por %p1153_p10, %p1152_p12 }
  0x77   : > { %p1155_p2 = pnand %p1154_p11, %p1148_p4 }
  0x79   : > { %1158 = shalt.err (!%p1155_p2)
}
  0x7a   : > { %s1929_s9 = smov 8   ;;  %s1930_s18 = smov 128  }
  0x7b   : > { %s1931_s23 = smov 256   ;;  %236 = sbr.rel (%p1562_p9) target bundleno = 604 (0x25c), region = 32 }
  0x7c   : > { %942 = dma.hbm_to_vmem [thread:$0]  (!%p1649_p1), %s1641_s0, 2048, %s1643_s17, %s1653_s28, %s1931_s23, %s1930_s18, %s1929_s9  }
  0x7d   : > { %s1932_s7 = sld [smem:[#allocation14_spill]] (!%p1562_p9)  ;;  %s1933_s21 = sld [smem:[#allocation22_spill]] (!%p1562_p9) }
  0x83   : > { %s238_s2 = sand.u32 1, %s1932_s7   ;;  %p1934_p12 = scmp.ne.s32.totalorder %s1933_s21, 0 }
  0x84   : > { %s778_s3 = sshll.u32 %s238_s2, 7  ;;  %s239_s5 = scalar_lea.sflag [#allocation4], %s238_s2 }
  0x85   : > { %s1687_s11 = scalar_lea.vmem [#allocation3], %s778_s3 }
  0x86   : > { %1260 = dma.done.wait (%p1934_p12), %s239_s5, 2048  }
  0x87   : > { %1262 = vsyncadd (%p1934_p12), %s239_s5, 4294965248  ;;  %s247_s27 = sand.u32 1, %s1289_s16   ;;  %p1935_p9 = scmp.ne.s32.totalorder %s1918_s15, 0 }
  0x88   : > { %s779_s22 = sshll.u32 %s247_s27, 7  ;;  %s248_s17 = scalar_lea.sflag [#allocation7], %s247_s27 }
  0x89   : > { %s1694_s0 = scalar_lea.vmem [#allocation6], %s779_s22 }
  0x8a   : > { %1264 = dma.done.wait (%p1935_p9), %s248_s17, 2048  }
  0x8b   : > { %1266 = vsyncadd (%p1935_p9), %s248_s17, 4294965248  ;;  %s1936_s8 = sld [smem:[#allocation16_spill]]  ;;  %s279_s28 = sand.u32 1, %s1277_s13  }
  0x8c   : > { %s780_s4 = sshll.u32 %s279_s28, 7  ;;  %s1937_s9 = sld [smem:[#allocation28_spill]] }
  0x8d   : > { %s1708_s23 = scalar_lea.vmem [#allocation8], %s780_s4  ;;  %s1938_s7 = sld [smem:[#allocation15_spill]] }
  0x91   : > { %p284_p4 = scmp.lt.s32.totalorder %s1936_s8, 1 }
  0x93   : > { %s1989_s8 = smov (!%p284_p4, %s1936_s8), 1  ;;  %p781_p5 = scmp.ne.s32.totalorder %s1938_s7, 0 }
  0x94   : > { %s286_s18 = scalar_lea.vmem %s1937_s9, %s1989_s8 }
  0x95   : > { %291 = sbr.rel (%p781_p5) target bundleno = 158 (0x9e), region = 44  ;;  %v782_v0 = vld [vmem:[%s286_s18] ss:$0 sm:$0xff] (!%p781_p5) }
  0x96   : > { %299 = vst [vmem:[#allocation2] sm:$0xff] (!%p781_p5), %v782_v0  ;;  %300 = vst [vmem:[#allocation2 + $0x8] sm:$0xff] (!%p781_p5), %v782_v0 }
  0x97   : > { %301 = vst [vmem:[#allocation2 + $0x10] sm:$0xff] (!%p781_p5), %v782_v0  ;;  %302 = vst [vmem:[#allocation2 + $0x18] sm:$0xff] (!%p781_p5), %v782_v0 }
  0x98   : > { %303 = vst [vmem:[#allocation2 + $0x20] sm:$0xff] (!%p781_p5), %v782_v0  ;;  %304 = vst [vmem:[#allocation2 + $0x28] sm:$0xff] (!%p781_p5), %v782_v0 }
  0x99   : > { %305 = vst [vmem:[#allocation2 + $0x30] sm:$0xff] (!%p781_p5), %v782_v0  ;;  %306 = vst [vmem:[#allocation2 + $0x38] sm:$0xff] (!%p781_p5), %v782_v0 }
  0x9a   : > { %307 = vst [vmem:[#allocation2 + $0x40] sm:$0xff] (!%p781_p5), %v782_v0  ;;  %308 = vst [vmem:[#allocation2 + $0x48] sm:$0xff] (!%p781_p5), %v782_v0 }
  0x9b   : > { %309 = vst [vmem:[#allocation2 + $0x50] sm:$0xff] (!%p781_p5), %v782_v0  ;;  %310 = vst [vmem:[#allocation2 + $0x58] sm:$0xff] (!%p781_p5), %v782_v0 }
  0x9c   : > { %311 = vst [vmem:[#allocation2 + $0x60] sm:$0xff] %v782_v0  ;;  %312 = vst [vmem:[#allocation2 + $0x68] sm:$0xff] %v782_v0 }
  0x9d   : > { %313 = vst [vmem:[#allocation2 + $0x70] sm:$0xff] %v782_v0  ;;  %314 = vst [vmem:[#allocation2 + $0x78] sm:$0xff] %v782_v0 }
  0x9e PF: > { %v331_v1 = vld [vmem:[%s1687_s11] sm:$0xff]  ;;  %v332_v2 = vld [vmem:[%s1687_s11 + $0x8] sm:$0xff]  ;;  %v333_v5 = vld [vmem:[%s1687_s11 + $0x10] sm:$0xff]  ;;  %s1939_s15 = sld [smem:[#allocation15_spill]] }
  0x9f   : > { %363 = vxpose.xlu0.b32.start [1/16] %v331_v1, 128  ;;  %v347_v3 = vld [vmem:[%s1694_s0] sm:$0xff]  ;;  %v348_v4 = vld [vmem:[%s1694_s0 + $0x8] sm:$0xff]  ;;  %v349_v7 = vld [vmem:[%s1694_s0 + $0x10] sm:$0xff] }
  0xa0   : > { %v882_v6 = vpack.c.bf16 %v348_v4, %v347_v3  ;;  %v350_v8 = vld [vmem:[%s1694_s0 + $0x18] sm:$0xff]  ;;  %v351_v10 = vld [vmem:[%s1694_s0 + $0x20] sm:$0xff]  ;;  %v352_v11 = vld [vmem:[%s1694_s0 + $0x28] sm:$0xff] }
  0xa1   : > { %v886_v9 = vpack.c.bf16 %v350_v8, %v349_v7  ;;  %v334_v12 = vld [vmem:[%s1687_s11 + $0x18] sm:$0xff]  ;;  %v890_v13 = vpack.c.bf16 %v352_v11, %v351_v10  ;;  %v353_v14 = vld [vmem:[%s1694_s0 + $0x30] sm:$0xff]  ;;  %v335_v16 = vld [vmem:[%s1687_s11 + $0x20] sm:$0xff] }
  0xa2   : > { %883 = vmatprep.subr.bf16.mxu0 %v882_v6  ;;  %914 = vmatprep.subr.bf16.mxu1 %v882_v6  ;;  %v354_v15 = vld [vmem:[%s1694_s0 + $0x38] sm:$0xff]  ;;  %v355_v18 = vld [vmem:[%s1694_s0 + $0x40] sm:$0xff]  ;;  %v356_v19 = vld [vmem:[%s1694_s0 + $0x48] sm:$0xff] }
  0xa3   : > { %364 = vxpose.xlu0.b32.cont [2/16] %v332_v2, 128  ;;  %885 = vmatpush3.bf16.msra.mxu0 %v882_v6  ;;  %v894_v17 = vpack.c.bf16 %v354_v15, %v353_v14  ;;  %v336_v20 = vld [vmem:[%s1687_s11 + $0x28] sm:$0xff]  ;;  %v898_v21 = vpack.c.bf16 %v356_v19, %v355_v18  ;;  %v357_v22 = vld [vmem:[%s1694_s0 + $0x50] sm:$0xff]  ;;  %v358_v23 = vld [vmem:[%s1694_s0 + $0x58] sm:$0xff] }
  0xa4   : > { %887 = vmatprep.subr.bf16.mxu0 %v886_v9  ;;  %922 = vmatpush3.bf16.msra.mxu1 %v882_v6  ;;  %v337_v24 = vld [vmem:[%s1687_s11 + $0x30] sm:$0xff]  ;;  %v902_v25 = vpack.c.bf16 %v358_v23, %v357_v22  ;;  %v359_v26 = vld [vmem:[%s1694_s0 + $0x60] sm:$0xff]  ;;  %v360_v27 = vld [vmem:[%s1694_s0 + $0x68] sm:$0xff]  ;;  %p783_p1 = scmp.ne.s32.totalorder %s1939_s15, 1 }
  0xa5   : > { %915 = vmatprep.subr.bf16.mxu1 %v886_v9  ;;  %v338_v28 = vld [vmem:[%s1687_s11 + $0x38] sm:$0xff]  ;;  %v906_v29 = vpack.c.bf16 %v360_v27, %v359_v26  ;;  %v361_v30 = vld [vmem:[%s1694_s0 + $0x70] sm:$0xff]  ;;  %v339_v32 = vld [vmem:[%s1687_s11 + $0x40] sm:$0xff] }
  0xa6   : > { %v362_v31 = vld [vmem:[%s1694_s0 + $0x78] sm:$0xff]  ;;  %v340_v34 = vld [vmem:[%s1687_s11 + $0x48] sm:$0xff]  ;;  %v341_v35 = vld [vmem:[%s1687_s11 + $0x50] sm:$0xff] }
  0xa7   : > { %365 = vxpose.xlu0.b32.cont [3/16] %v333_v5, 128  ;;  %889 = vmatpush3.bf16.msra.mxu0 %v886_v9  ;;  %v910_v33 = vpack.c.bf16 %v362_v31, %v361_v30  ;;  %v342_v36 = vld [vmem:[%s1687_s11 + $0x58] sm:$0xff]  ;;  %v343_v37 = vld [vmem:[%s1687_s11 + $0x60] sm:$0xff]  ;;  %v344_v38 = vld [vmem:[%s1687_s11 + $0x68] sm:$0xff] }
  0xa8   : > { %891 = vmatprep.subr.bf16.mxu0 %v890_v13  ;;  %923 = vmatpush3.bf16.msra.mxu1 %v886_v9  ;;  %v345_v39 = vld [vmem:[%s1687_s11 + $0x70] sm:$0xff]  ;;  %v346_v40 = vld [vmem:[%s1687_s11 + $0x78] sm:$0xff]  ;;  %v316_v57 = vld [vmem:[#allocation2 + $0x8] sm:$0xff] }
  0xa9   : > { %916 = vmatprep.subr.bf16.mxu1 %v890_v13  ;;  %v315_v58 = vld [vmem:[#allocation2] sm:$0xff]  ;;  %v318_v63 = vld [vmem:[#allocation2 + $0x18] sm:$0xff]  ;;  %v317_v0 = vld [vmem:[#allocation2 + $0x10] sm:$0xff] }
  0xaa   : > { %v320_v5 = vld [vmem:[#allocation2 + $0x28] sm:$0xff]  ;;  %v319_v6 = vld [vmem:[#allocation2 + $0x20] sm:$0xff]  ;;  %v322_v11 = vld [vmem:[#allocation2 + $0x38] sm:$0xff] }
  0xab   : > { %366 = vxpose.xlu0.b32.cont [4/16] %v334_v12, 128  ;;  %893 = vmatpush3.bf16.msra.mxu0 %v890_v13  ;;  %v321_v12 = vld [vmem:[#allocation2 + $0x30] sm:$0xff]  ;;  %v323_v18 = vld [vmem:[#allocation2 + $0x40] sm:$0xff]  ;;  %v326_v23 = vld [vmem:[#allocation2 + $0x58] sm:$0xff] }
  0xac   : > { %895 = vmatprep.subr.bf16.mxu0 %v894_v17  ;;  %924 = vmatpush3.bf16.msra.mxu1 %v890_v13  ;;  %v327_v30 = vld [vmem:[#allocation2 + $0x60] sm:$0xff] }
  0xad   : > { %917 = vmatprep.subr.bf16.mxu1 %v894_v17 }
  0xaf   : > { %367 = vxpose.xlu0.b32.cont [5/16] %v335_v16, 128  ;;  %897 = vmatpush3.bf16.msra.mxu0 %v894_v17 }
  0xb0   : > { %899 = vmatprep.subr.bf16.mxu0 %v898_v21  ;;  %925 = vmatpush3.bf16.msra.mxu1 %v894_v17  ;;  %v324_v17 = vld [vmem:[#allocation2 + $0x48] sm:$0xff] }
  0xb1   : > { %918 = vmatprep.subr.bf16.mxu1 %v898_v21 }
  0xb3   : > { %368 = vxpose.xlu0.b32.cont [6/16] %v336_v20, 128  ;;  %901 = vmatpush3.bf16.msra.mxu0 %v898_v21 }
  0xb4   : > { %903 = vmatprep.subr.bf16.mxu0 %v902_v25  ;;  %926 = vmatpush3.bf16.msra.mxu1 %v898_v21 }
  0xb5   : > { %919 = vmatprep.subr.bf16.mxu1 %v902_v25 }
  0xb7   : > { %369 = vxpose.xlu0.b32.cont [7/16] %v337_v24, 128  ;;  %905 = vmatpush3.bf16.msra.mxu0 %v902_v25  ;;  %v325_v24 = vld [vmem:[#allocation2 + $0x50] sm:$0xff] }
  0xb8   : > { %907 = vmatprep.subr.bf16.mxu0 %v906_v29  ;;  %927 = vmatpush3.bf16.msra.mxu1 %v902_v25 }
  0xb9   : > { %920 = vmatprep.subr.bf16.mxu1 %v906_v29 }
  0xbb   : > { %370 = vxpose.xlu0.b32.cont [8/16] %v338_v28, 128  ;;  %909 = vmatpush3.bf16.msra.mxu0 %v906_v29 }
  0xbc   : > { %911 = vmatprep.subr.bf16.mxu0 %v910_v33  ;;  %928 = vmatpush3.bf16.msra.mxu1 %v906_v29  ;;  %v328_v29 = vld [vmem:[#allocation2 + $0x68] sm:$0xff] }
  0xbd   : > { %921 = vmatprep.subr.bf16.mxu1 %v910_v33 }
  0xbf   : > { %371 = vxpose.xlu0.b32.cont [9/16] %v339_v32, 128  ;;  %913 = vmatpush3.bf16.msra.mxu0 %v910_v33 }
  0xc0   : > { %929 = vmatpush3.bf16.msra.mxu1 %v910_v33 }
  0xc3   : > { %372 = vxpose.xlu0.b32.cont [10/16] %v340_v34, 128 }
  0xc7   : > { %373 = vxpose.xlu0.b32.cont [11/16] %v341_v35, 128  ;;  %v330_v35 = vld [vmem:[#allocation2 + $0x78] sm:$0xff] }
  0xcb   : > { %374 = vxpose.xlu0.b32.cont [12/16] %v342_v36, 128  ;;  %v329_v36 = vld [vmem:[#allocation2 + $0x70] sm:$0xff] }
  0xcf   : > { %375 = vxpose.xlu0.b32.cont [13/16] %v343_v37, 128 }
  0xd3   : > { %376 = vxpose.xlu0.b32.cont [14/16] %v344_v38, 128 }
  0xd7   : > { %377 = vxpose.xlu0.b32.cont [15/16] %v345_v39, 128 }
  0xdb   : > { %378 = vxpose.xlu0.b32.end [16/16] %v346_v40, 128 }
 0x11f   : > { %v379_v41 = vpop.trf.xlu0 }
 0x120   : > { %858 = vmatprep.mubr.f32.mxu0 %v379_v41 }
 0x123   : > { %v380_v42 = vpop.trf.xlu0 }
 0x124   : > { %859 = vmatmul.mubr.f32.vlgmr.msra.gmra.mrb[0].mxu0 %v380_v42 }
 0x127   : > { %v381_v43 = vpop.trf.xlu0 }
 0x128   : > { %861 = vmatprep.mubr.f32.mxu0 %v381_v43 }
 0x12b   : > { %v382_v44 = vpop.trf.xlu0 }
 0x12c   : > { %862 = vmatmul.mubr.f32.gmra.mrb[2].mxu0 %v382_v44 }
 0x12f   : > { %v383_v45 = vpop.trf.xlu0 }
 0x130   : > { %864 = vmatprep.mubr.f32.mxu0 %v383_v45 }
 0x133   : > { %v384_v46 = vpop.trf.xlu0 }
 0x134   : > { %865 = vmatmul.mubr.f32.gmra.mrb[4].mxu0 %v384_v46 }
 0x137   : > { %v385_v47 = vpop.trf.xlu0 }
 0x138   : > { %867 = vmatprep.mubr.f32.mxu0 %v385_v47 }
 0x13b   : > { %v386_v48 = vpop.trf.xlu0 }
 0x13c   : > { %868 = vmatmul.mubr.f32.gmra.mrb[6].mxu0 %v386_v48 }
 0x13f   : > { %v387_v49 = vpop.trf.xlu0 }
 0x140   : > { %870 = vmatprep.mubr.f32.mxu1 %v387_v49 }
 0x143   : > { %v388_v50 = vpop.trf.xlu0 }
 0x144   : > { %871 = vmatmul.mubr.f32.vlgmr.msra.gmra.mrb[0].mxu1 %v388_v50 }
 0x147   : > { %v389_v51 = vpop.trf.xlu0 }
 0x148   : > { %873 = vmatprep.mubr.f32.mxu1 %v389_v51 }
 0x14b   : > { %v390_v52 = vpop.trf.xlu0 }
 0x14c   : > { %874 = vmatmul.mubr.f32.gmra.mrb[2].mxu1 %v390_v52 }
 0x14f   : > { %v391_v53 = vpop.trf.xlu0 }
 0x150   : > { %876 = vmatprep.mubr.f32.mxu1 %v391_v53 }
 0x153   : > { %v392_v54 = vpop.trf.xlu0 }
 0x154   : > { %877 = vmatmul.mubr.f32.gmra.mrb[4].mxu1 %v392_v54 }
 0x157   : > { %v393_v55 = vpop.trf.xlu0 }
 0x158   : > { %879 = vmatprep.mubr.f32.mxu1 %v393_v55 }
 0x15b   : > { %v394_v56 = vpop.trf.xlu0 }
 0x15c   : > { %880 = vmatmul.mubr.f32.gmra.mrb[6].mxu1 %v394_v56 }
 0x1f7   : > { %v860_v59 = vpop.f32.mrb[0].mxu0 }
 0x1f8   : > { %v541_v60 = vadd.f32 %v860_v59, %v316_v57  ;;  %v461_v61 = vpop.f32.mrb[1].mxu0 }
 0x1f9   : > { %v540_v62 = vadd.f32 %v461_v61, %v315_v58 }
 0x1fa   : > { %557 = vst [vmem:[#allocation2 + $0x8] sm:$0xff] %v541_v60 }
 0x1fb   : > { %556 = vst [vmem:[#allocation2] sm:$0xff] %v540_v62 }
 0x1ff   : > { %v863_v1 = vpop.f32.mrb[2].mxu0 }
 0x200   : > { %v543_v2 = vadd.f32 %v863_v1, %v318_v63  ;;  %v471_v3 = vpop.f32.mrb[3].mxu0 }
 0x201   : > { %v542_v4 = vadd.f32 %v471_v3, %v317_v0  ;;  %v577_v42 = vld [vmem:[#allocation2 + $0x8] sm:$0xff] (!%p783_p1) }
 0x202   : > { %559 = vst [vmem:[#allocation2 + $0x18] sm:$0xff] %v543_v2  ;;  %v576_v41 = vld [vmem:[#allocation2] sm:$0xff] (!%p783_p1)  ;;  %593 = vst [vmem:[%s1708_s23 + $0x8] sm:$0xff] (!%p783_p1), %v577_v42 }
 0x203   : > { %558 = vst [vmem:[#allocation2 + $0x10] sm:$0xff] %v542_v4  ;;  %592 = vst [vmem:[%s1708_s23] sm:$0xff] (!%p783_p1), %v576_v41 }
 0x207   : > { %v866_v7 = vpop.f32.mrb[4].mxu0 }
 0x208   : > { %v545_v8 = vadd.f32 %v866_v7, %v320_v5  ;;  %v481_v9 = vpop.f32.mrb[5].mxu0 }
 0x209   : > { %v544_v10 = vadd.f32 %v481_v9, %v319_v6  ;;  %v579_v44 = vld [vmem:[#allocation2 + $0x18] sm:$0xff] (!%p783_p1) }
 0x20a   : > { %561 = vst [vmem:[#allocation2 + $0x28] sm:$0xff] %v545_v8  ;;  %v578_v43 = vld [vmem:[#allocation2 + $0x10] sm:$0xff] (!%p783_p1)  ;;  %595 = vst [vmem:[%s1708_s23 + $0x18] sm:$0xff] (!%p783_p1), %v579_v44 }
 0x20b   : > { %560 = vst [vmem:[#allocation2 + $0x20] sm:$0xff] %v544_v10  ;;  %594 = vst [vmem:[%s1708_s23 + $0x10] sm:$0xff] (!%p783_p1), %v578_v43 }
 0x20f   : > { %v869_v13 = vpop.f32.mrb[6].mxu0 }
 0x210   : > { %v547_v14 = vadd.f32 %v869_v13, %v322_v11  ;;  %v491_v15 = vpop.f32.mrb[7].mxu0 }
 0x211   : > { %v546_v16 = vadd.f32 %v491_v15, %v321_v12  ;;  %v581_v46 = vld [vmem:[#allocation2 + $0x28] sm:$0xff] (!%p783_p1) }
 0x212   : > { %563 = vst [vmem:[#allocation2 + $0x38] sm:$0xff] %v547_v14  ;;  %v580_v45 = vld [vmem:[#allocation2 + $0x20] sm:$0xff] (!%p783_p1)  ;;  %597 = vst [vmem:[%s1708_s23 + $0x28] sm:$0xff] (!%p783_p1), %v581_v46 }
 0x213   : > { %562 = vst [vmem:[#allocation2 + $0x30] sm:$0xff] %v546_v16  ;;  %596 = vst [vmem:[%s1708_s23 + $0x20] sm:$0xff] (!%p783_p1), %v580_v45 }
 0x217   : > { %v872_v19 = vpop.f32.mrb[0].mxu1 }
 0x218   : > { %v549_v20 = vadd.f32 %v872_v19, %v324_v17  ;;  %v501_v21 = vpop.f32.mrb[1].mxu1 }
 0x219   : > { %v548_v22 = vadd.f32 %v501_v21, %v323_v18  ;;  %v583_v48 = vld [vmem:[#allocation2 + $0x38] sm:$0xff] (!%p783_p1) }
 0x21a   : > { %565 = vst [vmem:[#allocation2 + $0x48] sm:$0xff] %v549_v20  ;;  %v582_v47 = vld [vmem:[#allocation2 + $0x30] sm:$0xff] (!%p783_p1)  ;;  %599 = vst [vmem:[%s1708_s23 + $0x38] sm:$0xff] (!%p783_p1), %v583_v48 }
 0x21b   : > { %564 = vst [vmem:[#allocation2 + $0x40] sm:$0xff] %v548_v22  ;;  %598 = vst [vmem:[%s1708_s23 + $0x30] sm:$0xff] (!%p783_p1), %v582_v47 }
 0x21f   : > { %v875_v25 = vpop.f32.mrb[2].mxu1 }
 0x220   : > { %v551_v26 = vadd.f32 %v875_v25, %v326_v23  ;;  %v511_v27 = vpop.f32.mrb[3].mxu1 }
 0x221   : > { %v550_v28 = vadd.f32 %v511_v27, %v325_v24  ;;  %v585_v50 = vld [vmem:[#allocation2 + $0x48] sm:$0xff] (!%p783_p1) }
 0x222   : > { %567 = vst [vmem:[#allocation2 + $0x58] sm:$0xff] %v551_v26  ;;  %v584_v49 = vld [vmem:[#allocation2 + $0x40] sm:$0xff] (!%p783_p1)  ;;  %601 = vst [vmem:[%s1708_s23 + $0x48] sm:$0xff] (!%p783_p1), %v585_v50 }
 0x223   : > { %566 = vst [vmem:[#allocation2 + $0x50] sm:$0xff] %v550_v28  ;;  %600 = vst [vmem:[%s1708_s23 + $0x40] sm:$0xff] (!%p783_p1), %v584_v49 }
 0x227   : > { %v878_v31 = vpop.f32.mrb[4].mxu1 }
 0x228   : > { %v553_v32 = vadd.f32 %v878_v31, %v328_v29  ;;  %v521_v33 = vpop.f32.mrb[5].mxu1 }
 0x229   : > { %v552_v34 = vadd.f32 %v521_v33, %v327_v30  ;;  %v587_v52 = vld [vmem:[#allocation2 + $0x58] sm:$0xff] (!%p783_p1) }
 0x22a   : > { %569 = vst [vmem:[#allocation2 + $0x68] sm:$0xff] %v553_v32  ;;  %v586_v51 = vld [vmem:[#allocation2 + $0x50] sm:$0xff] (!%p783_p1)  ;;  %603 = vst [vmem:[%s1708_s23 + $0x58] sm:$0xff] (!%p783_p1), %v587_v52 }
 0x22b   : > { %568 = vst [vmem:[#allocation2 + $0x60] sm:$0xff] %v552_v34  ;;  %602 = vst [vmem:[%s1708_s23 + $0x50] sm:$0xff] (!%p783_p1), %v586_v51 }
 0x22d   : > { %575 = sbr.rel (%p783_p1) target bundleno = 572 (0x23c), region = 48 }
 0x22f   : > { %v881_v37 = vpop.f32.mrb[6].mxu1 }
 0x230   : > { %v555_v38 = vadd.f32 %v881_v37, %v330_v35  ;;  %v531_v39 = vpop.f32.mrb[7].mxu1 }
 0x231   : > { %v554_v40 = vadd.f32 %v531_v39, %v329_v36  ;;  %v589_v54 = vld [vmem:[#allocation2 + $0x68] sm:$0xff] (!%p783_p1) }
 0x232   : > { %571 = vst [vmem:[#allocation2 + $0x78] sm:$0xff] %v555_v38  ;;  %v588_v53 = vld [vmem:[#allocation2 + $0x60] sm:$0xff] (!%p783_p1)  ;;  %605 = vst [vmem:[%s1708_s23 + $0x68] sm:$0xff] (!%p783_p1), %v589_v54 }
 0x233   : > { %570 = vst [vmem:[#allocation2 + $0x70] sm:$0xff] %v554_v40  ;;  %604 = vst [vmem:[%s1708_s23 + $0x60] sm:$0xff] (!%p783_p1), %v588_v53 }
 0x239   : > { %v591_v56 = vld [vmem:[#allocation2 + $0x78] sm:$0xff] }
 0x23a   : > { %v590_v55 = vld [vmem:[#allocation2 + $0x70] sm:$0xff]  ;;  %607 = vst [vmem:[%s1708_s23 + $0x78] sm:$0xff] %v591_v56 }
 0x23b   : > { %606 = vst [vmem:[%s1708_s23 + $0x70] sm:$0xff] %v590_v55 }
 0x23c PF: > { %s1940_s21 = sld [smem:[#allocation17_spill]]  ;;  %s1941_s2 = sld [smem:[#allocation16_spill]] }
 0x23d   : > { %s1942_s3 = sld [smem:[#allocation18_spill]]  ;;  %s626_s17 = sshll.u32 %s1708_s23, 4  ;;  %s1764_s17 = int_to_ptr.vmem [resolvable:$true] %s626_s17 }
 0x23e   : > { %s1943_s6 = sld [smem:[#allocation29_spill]]  ;;  %s1773_s9 = scalar_lea.sflag [#allocation5], %s279_s28 }
 0x23f   : > { %s1159_s18 = scalar_lea.vmem %s1764_s17, 2048  ;;  %p1944_p8 = scmp.ne.s32.totalorder %s1921_s10, 0 }
 0x240   : > { %p1160_p7 = scmp.ne.s32.totalorder %s1764_s17, %s1159_s18  ;;  %s1348_s23 = smov [#allocation8]  }
 0x241   : > { %s1163_s7 = sshll.u32 %s1348_s23, 4  ;;  %s1164_s7 = int_to_ptr.vmem [resolvable:$false] %s1163_s7 }
 0x242   : > { %s793_s5 = sshll.u32 %s1940_s21, 5  ;;  %p1161_p13 = pnand %p1160_p7, %p1944_p8 }
 0x243   : > { %s621_s11 = sadd.s32 %s1941_s2, %s793_s5  ;;  %s787_s27 = sshll.u32 %s1942_s3, 6 }
 0x244   : > { %s623_s22 = sadd.s32 %s787_s27, %s621_s11  ;;  %p1162_p0 = pneg %p1161_p13 }
 0x245   : > { %s788_s0 = sshll.u32 %s623_s22, 7  ;;  %s1165_s15 = scalar_lea.vmem %s1164_s7, 4096 }
 0x246   : > { %s1769_s19 = scalar_lea.hbm %s1943_s6, %s788_s0  ;;  %p1166_p3 = scmp.lt.s32.totalorder %s1764_s17, %s1164_s7 }
 0x247   : > { %p1167_p6 = scmp.lt.s32.totalorder %s1165_s15, %s1159_s18 }
 0x249   : > { %p1168_p10 = por %p1167_p6, %p1166_p3 }
 0x24b   : > { %p1169_p11 = pnand %p1168_p10, %p1162_p0 }
 0x24d   : > { %1172 = shalt.err (!%p1169_p11)
}
 0x24e   : > { %s1173_s28 = scalar_lea.hbm %s1769_s19, 2048  ;;  %s1177_s3 = scalar_lea.hbm %s1943_s6, 16384 }
 0x24f   : > { %p1174_p2 = scmp.ne.s32.totalorder %s1769_s19, %s1173_s28  ;;  %p1178_p4 = scmp.lt.u32.totalorder %s1769_s19, %s1943_s6 }
 0x250   : > { %p1179_p5 = scmp.lt.u32.totalorder %s1177_s3, %s1173_s28  ;;  %p1181_p7 = scmp.lt.u32.totalorder %s1173_s28, %s1769_s19 }
 0x251   : > { %p1175_p12 = pnand %p1174_p2, %p1944_p8 }
 0x252   : > { %p1180_p1 = por %p1179_p5, %p1178_p4 }
 0x253   : > { %p1176_p9 = pneg %p1175_p12 }
 0x254   : > { %p1182_p13 = por %p1181_p7, %p1180_p1 }
 0x256   : > { %p1183_p0 = pnand %p1182_p13, %p1176_p9 }
 0x258   : > { %1186 = shalt.err (!%p1183_p0)
}
 0x259   : > { %s1349_s27 = smov 128   ;;  %s1350_s22 = smov 256  }
 0x25a   : > { %s1351_s0 = smov 8  }
 0x25b   : > { %934 = dma.vmem_to_hbm [thread:$0]  (%p1944_p8), %s1764_s17, 2048, %s1769_s19, %s1773_s9, %s1349_s27, %s1350_s22, %s1351_s0  }
 0x25c PF: > { %s1945_s8 = sld [smem:[#allocation12_spill]]  ;;  %p948_p3 = scmp.ge.s32.totalorder %s1341_s29, 2 }
 0x25d   : > { %p1946_p6 = scmp.ne.s32.totalorder %s1924_s24, 0 }
 0x25f   : > { %p944_p10 = pnand %p948_p3, %p1946_p6 }
 0x262   : > { %s641_s4 = sand.u32 1, %s1945_s8  }
 0x263   : > { %s642_s18 = scalar_lea.sflag [#allocation5], %s641_s4 }
 0x264   : > { %1268 = dma.done.wait (!%p944_p10), %s642_s18, 2048  }
 0x265   : > { %1270 = vsyncadd (!%p944_p10), %s642_s18, 4294965248  ;;  %s22_s29 = sadd.s32 1, %s1341_s29   ;;  %s1948_s10 = smov %s1633_s12 }
 0x266   : > { %p1802_p11 = scmp.ge.s32.totalorder %s22_s29, 18   ;;  %s1949_s17 = sld [smem:[#allocation13_spill]] }
 0x267   : > { %s1950_s19 = sld [smem:[#allocation25_spill]]  ;;  %s1951_s18 = sld [smem:[#allocation14_spill]] }
 0x268   : > { %s1952_s24 = sld [smem:[#allocation19_spill]]  ;;  %s1953_s9 = sld [smem:[#allocation20_spill]] }
 0x269   : > { %s1954_s7 = sld [smem:[#allocation21_spill]]  ;;  %s1955_s28 = sld [smem:[#allocation23_spill]] }
 0x26a   : > { %s1956_s27 = sld [smem:[#allocation24_spill]]  ;;  %s1957_s12 = smov %s1277_s13 }
 0x26b   : > { %s1958_s2 = sld [smem:[#allocation26_spill]]  ;;  %s1959_s13 = smov %s1281_s14 }
 0x26c   : > { %s1960_s14 = smov %s1948_s10  ;;  %s1962_s15 = smov %s1289_s16 }
 0x26d   : > { %s1963_s16 = smov %s1949_s17  ;;  %s1964_s17 = smov %s1950_s19 }
 0x26e   : > { %s1965_s19 = smov %s1305_s20  ;;  %s1966_s20 = smov %s1630_s30 }
 0x26f   : > { %s1967_s21 = smov %s1325_s25  ;;  %s1968_s22 = smov %s1329_s26 }
 0x270   : > { %s1969_s23 = smov %s1952_s24  ;;  %s1970_s24 = smov %s1953_s9 }
 0x271   : > { %s1971_s25 = smov %s1954_s7  ;;  %s1972_s26 = smov %s1955_s28 }
 0x272   : > { %s1973_s28 = smov %s1958_s2  ;;  %21 = sbr.rel (!%p1802_p11) target bundleno = 18 (0x12), region = 101 }
 0x279   :  { %647 = vsyncpa [#allocation4], 1 }
 0x27a   :  { %649 = vsyncpa [#allocation4 + $0x1], 1 }
 0x27b   :  { %650 = vsyncpa [#allocation7], 1 }
 0x27c   :  { %652 = vsyncpa [#allocation7 + $0x1], 1 }
 0x27d   :  { %653 = vsyncpa [#allocation5], 1 }
 0x27e   :  { %655 = vsyncpa [#allocation5 + $0x1], 1 }

</bundles_post_ra>
